<compile_context>
chip_gen: v6e
topology: v6e:2x2x1
jax: 0.10.0
libtpu: 0.0.40
codegen_flags: <defaults>
</compile_context>

<pallas_src>
import functools

import jax
import jax.numpy as jnp
import numpy as np
from jax.experimental import pallas as pl
from jax.experimental.pallas import tpu as pltpu


def _pick_tile(n, target):
    """Largest tile <= target that divides n and is a multiple of 8 (else n)."""
    if n <= target:
        return n
    for d in range(target, 7, -1):
        if n % d == 0 and d % 8 == 0:
            return d
    return n  # fallback: one full-size tile (always correct, may be large)


def _vmem_limit_bytes():
    """Generation-aware VMEM limit: 3/4 of physical capacity."""
    try:
        cap = int(pltpu.get_tpu_info().vmem_capacity_bytes)
    except Exception:
        cap = 64 * 1024 * 1024  # conservative (v7x-sized) fallback
    return max(32 * 1024 * 1024, (cap * 3) // 4)


def _default_exp_dtype(compute_dtype):
    """bf16 exp only where the EUP supports it (v6e / v7x); fp32 otherwise."""
    if np.dtype(compute_dtype) == np.dtype(jnp.float32):
        return jnp.float32
    try:
        kind = jax.devices()[0].device_kind.lower()
    except Exception:
        return jnp.float32
    if any(v in kind for v in ("v2", "v3", "v4", "v5")):
        return jnp.float32
    return compute_dtype


# ---------------------------------------------------------------------------
# Kernel 1: flash-style (no attention writeback).  grid = (B, N//tq, N//tk)
# ---------------------------------------------------------------------------
def _flash_kernel(q_ref, k_ref, v_ref, o_ref, m_sc, l_sc, acc_sc,
                  *, compute_dtype, exp_dtype):
    ki = pl.program_id(2)

    @pl.when(ki == 0)
    def _():
        m_sc[...] = jnp.full_like(m_sc, -jnp.inf)
        l_sc[...] = jnp.zeros_like(l_sc)
        acc_sc[...] = jnp.zeros_like(acc_sc)

    q = q_ref[0].astype(compute_dtype)                       # (tq, Kd)
    k = k_ref[0]                                             # (tk, Kd) compute_dtype

    # Energy tile; contract the small projection dim of both operands (no
    # explicit transpose materialized).
    s = jax.lax.dot_general(q, k, (((1,), (1,)), ((), ())),
                            preferred_element_type=jnp.float32)      # (tq, tk)

    m_prev = m_sc[...]
    m_new = jnp.maximum(m_prev, jnp.max(s, axis=-1, keepdims=True))
    alpha = jnp.exp(m_prev - m_new)                          # fp32
    p = jnp.exp((s - m_new).astype(exp_dtype))               # bf16 EUP on v6e/v7x
    l_sc[...] = alpha * l_sc[...] + jnp.sum(p, axis=-1, keepdims=True,
                                            dtype=jnp.float32)
    acc_sc[...] = alpha * acc_sc[...] + jnp.dot(
        p.astype(compute_dtype), v_ref[0], preferred_element_type=jnp.float32)
    m_sc[...] = m_new

    @pl.when(ki == pl.num_programs(2) - 1)
    def _():
        # Exact normalization, once per query tile (outside the key loop).
        o_ref[0] = (acc_sc[...] / l_sc[...]).astype(o_ref.dtype)


# ---------------------------------------------------------------------------
# Kernel 2: query-tiled, dense attention output.  grid = (B, N//tq)
# ---------------------------------------------------------------------------
def _attn_kernel(q_ref, k_ref, v_ref, o_ref, attn_ref, *, compute_dtype):
    q = q_ref[0].astype(compute_dtype)                       # (tq, Kd)
    k = k_ref[0]                                             # (N, Kd) compute_dtype
    s = jax.lax.dot_general(q, k, (((1,), (1,)), ((), ())),
                            preferred_element_type=jnp.float32)      # (tq, N)
    m = jnp.max(s, axis=-1, keepdims=True)
    p = jnp.exp(s - m)
    attn = p / jnp.sum(p, axis=-1, keepdims=True)            # exact: attn is returned
    out = jnp.dot(attn.astype(compute_dtype), v_ref[0],
                  preferred_element_type=jnp.float32)        # (tq, C)
    o_ref[0] = out.astype(o_ref.dtype)
    attn_ref[0] = attn.astype(attn_ref.dtype)


# ---------------------------------------------------------------------------
# Wrapper
# ---------------------------------------------------------------------------
def self_attn_2d(x, wq, bq, wk, bk, wv, bv, gamma, return_attn=False, *,
                 compute_dtype=jnp.bfloat16, attn_dtype=jnp.float32,
                 q_tile=256, kv_tile=512):
    """x: (B, C, W, H).  Torch Conv2d-1x1 weights: wq/wk (C//8, C), wv (C, C),
    biases bq/bk (C//8,), bv (C,), gamma scalar."""
    del bk  # shifts energy by a per-query-row constant -> softmax-invariant
    B, C, W, H = x.shape
    N = W * H
    f32 = jnp.float32

    xf = x.reshape(B, C, N).astype(f32)

    # 1x1-conv projections as single XLA matmuls (NCHW->NC transpose fuses into
    # the contraction).  bq folds into q, bv into V; no ones-column needed.
    q = jnp.einsum('bcn,oc->bno', xf, wq.astype(f32)) + bq.astype(f32)       # (B,N,Ck) fp32
    k = jnp.einsum('bcn,oc->bno', xf, wk.astype(f32)).astype(compute_dtype)  # (B,N,Ck)
    v = (jnp.einsum('bcn,oc->bno', xf, wv.astype(f32))
         + bv.astype(f32)).astype(compute_dtype)                             # (B,N,C)
    Kd = q.shape[-1]

    exp_dtype = _default_exp_dtype(compute_dtype)
    vmem_limit = _vmem_limit_bytes()
    tq = _pick_tile(N, q_tile)

    if not return_attn:
        # Flash path: never materializes the (N, N) attention matrix.
        tk = _pick_tile(N, kv_tile)
        grid = (B, N // tq, N // tk)
        y = pl.pallas_call(
            functools.partial(_flash_kernel, compute_dtype=compute_dtype,
                              exp_dtype=exp_dtype),
            out_shape=jax.ShapeDtypeStruct((B, N, C), f32),
            grid_spec=pltpu.PrefetchScalarGridSpec(
                num_scalar_prefetch=0,
                grid=grid,
                in_specs=[
                    pl.BlockSpec((1, tq, Kd), lambda b, qi, ki: (b, qi, 0)),  # queries (fp32)
                    pl.BlockSpec((1, tk, Kd), lambda b, qi, ki: (b, ki, 0)),  # keys (bf16)
                    pl.BlockSpec((1, tk, C), lambda b, qi, ki: (b, ki, 0)),   # values (bf16)
                ],
                out_specs=pl.BlockSpec((1, tq, C), lambda b, qi, ki: (b, qi, 0)),
                scratch_shapes=[
                    pltpu.VMEM((tq, 1), f32),     # running max
                    pltpu.VMEM((tq, 1), f32),     # running sum
                    pltpu.VMEM((tq, C), f32),     # output accumulator
                ],
            ),
            compiler_params=pltpu.CompilerParams(
                dimension_semantics=("parallel", "parallel", "arbitrary"),
                vmem_limit_bytes=vmem_limit,
            ),
        )(q, k, v)
        attn = None
    else:
        # Query-tiled path that also emits the (B, N, N) attention map.
        # Note: for very large N on v7x (64 MiB VMEM) tile keys as well; at the
        # sizes this module is used for, the full-key block fits comfortably.
        grid = (B, N // tq)
        y, attn = pl.pallas_call(
            functools.partial(_attn_kernel, compute_dtype=compute_dtype),
            out_shape=(jax.ShapeDtypeStruct((B, N, C), f32),
                       jax.ShapeDtypeStruct((B, N, N), attn_dtype)),
            grid_spec=pltpu.PrefetchScalarGridSpec(
                num_scalar_prefetch=0,
                grid=grid,
                in_specs=[
                    pl.BlockSpec((1, tq, Kd), lambda b, qi: (b, qi, 0)),  # queries
                    pl.BlockSpec((1, N, Kd), lambda b, qi: (b, 0, 0)),    # all keys
                    pl.BlockSpec((1, N, C), lambda b, qi: (b, 0, 0)),     # all values
                ],
                out_specs=[
                    pl.BlockSpec((1, tq, C), lambda b, qi: (b, qi, 0)),
                    pl.BlockSpec((1, tq, N), lambda b, qi: (b, qi, 0)),
                ],
            ),
            compiler_params=pltpu.CompilerParams(
                dimension_semantics=("parallel", "parallel"),
                vmem_limit_bytes=vmem_limit,
            ),
        )(q, k, v)

    # Fused XLA epilogue: (B,N,C) -> NCHW, gamma scale, residual add.
    gamma_f = jnp.asarray(gamma, f32)
    out = (gamma_f * jnp.transpose(y, (0, 2, 1)).reshape(B, C, W, H)
           + x.astype(f32)).astype(x.dtype)
    if return_attn:
        return out, attn
    return out


def _reference(x, wq, bq, wk, bk, wv, bv, gamma):
    """Pure-JAX mirror of the PyTorch forward (for correctness check)."""
    B, C, W, H = x.shape
    N = W * H
    xf = x.reshape(B, C, N)
    q = jnp.einsum('oc,bcn->bon', wq, xf) + bq[None, :, None]   # (B, Cq, N)
    k = jnp.einsum('oc,bcn->bon', wk, xf) + bk[None, :, None]
    v = jnp.einsum('oc,bcn->bon', wv, xf) + bv[None, :, None]
    energy = jnp.einsum('bqn,bqm->bnm', q, k)                   # (B, N, N)
    attn = jax.nn.softmax(energy, axis=-1)
    out = jnp.einsum('bcm,bnm->bcn', v, attn).reshape(B, C, W, H)
    return gamma * out + x, attn


if __name__ == "__main__":
    B, C, W, H = 2, 32, 16, 16          # in_dim = 32 -> C//8 = 4, N = 256
    Cq = C // 8

    key = jax.random.PRNGKey(0)
    kx, k1, k2, k3, k4, k5, k6 = jax.random.split(key, 7)

    x = jax.random.normal(kx, (B, C, W, H), jnp.float32)
    wq = jax.random.normal(k1, (Cq, C), jnp.float32) * 0.1
    bq = jax.random.normal(k2, (Cq,), jnp.float32) * 0.1
    wk = jax.random.normal(k3, (Cq, C), jnp.float32) * 0.1
    bk = jax.random.normal(k4, (Cq,), jnp.float32) * 0.1
    wv = jax.random.normal(k5, (C, C), jnp.float32) * 0.1
    bv = jax.random.normal(k6, (C,), jnp.float32) * 0.1
    # PyTorch inits gamma = 0 (output == input); use a nonzero deterministic
    # value so the attention path actually contributes.
    gamma = jnp.float32(0.1)

    ref_out, ref_attn = _reference(x, wq, bq, wk, bk, wv, bv, gamma)

    # 1) fp32 path with dense attention map (query-tiled kernel, exact softmax).
    out, attn = self_attn_2d(x, wq, bq, wk, bk, wv, bv, gamma,
                             return_attn=True, compute_dtype=jnp.float32,
                             q_tile=128)
    out = jax.block_until_ready(out)
    attn = jax.block_until_ready(attn)
    assert out.shape == (B, C, W, H) and attn.shape == (B, W * H, W * H)
    assert jnp.allclose(out, ref_out, atol=5e-3, rtol=5e-3)
    assert jnp.allclose(attn, ref_attn, atol=3e-3, rtol=5e-3)

    # 2) fp32 flash path, multiple key tiles -> exercises the online-softmax
    #    accumulation across the 'arbitrary' grid axis.
    out2 = self_attn_2d(x, wq, bq, wk, bk, wv, bv, gamma,
                        return_attn=False, compute_dtype=jnp.float32,
                        q_tile=128, kv_tile=64)
    out2 = jax.block_until_ready(out2)
    assert jnp.allclose(out2, ref_out, atol=5e-3, rtol=5e-3)

    # 3) default bf16 streaming path (fp32 accumulation), looser tolerance.
    out3 = self_attn_2d(x, wq, bq, wk, bk, wv, bv, gamma, return_attn=False)
    out3 = jax.block_until_ready(out3)
    assert jnp.allclose(out3, ref_out, atol=5e-2, rtol=5e-2)

    print("KERNEL_OK")
</pallas_src>

<mosaic_0001>
module attributes {stable_mosaic.version = 11 : i64} {
  func.func @_attn_kernel(%arg0: i32, %arg1: i32, %arg2: memref<1x128x4xf32, #tpu.memory_space<vmem>>, %arg3: memref<1x256x4xf32, #tpu.memory_space<vmem>>, %arg4: memref<1x256x32xf32, #tpu.memory_space<vmem>>, %arg5: memref<1x128x32xf32, #tpu.memory_space<vmem>>, %arg6: memref<1x128x256xf32, #tpu.memory_space<vmem>>) attributes {dimension_semantics = [#tpu.dimension_semantics<parallel>, #tpu.dimension_semantics<parallel>], iteration_bounds = array<i64: 2, 2>, scalar_prefetch = 0 : i64, scratch_operands = 0 : i64, tpu.core_type = #tpu.core_type<tc>, window_params = [{transform_indices = @transform_0, window_bounds = array<i64: 1, 128, 4>}, {transform_indices = @transform_1, window_bounds = array<i64: 1, 256, 4>}, {transform_indices = @transform_2, window_bounds = array<i64: 1, 256, 32>}, {transform_indices = @transform_3, window_bounds = array<i64: 1, 128, 32>}, {transform_indices = @transform_4, window_bounds = array<i64: 1, 128, 256>}]} {
    %c0 = arith.constant 0 : index
    %c0_0 = arith.constant 0 : index
    %c0_1 = arith.constant 0 : index
    %0 = vector.load %arg2[%c0, %c0_0, %c0_1] : memref<1x128x4xf32, #tpu.memory_space<vmem>>, vector<1x128x4xf32>
    %1 = vector.shape_cast %0 : vector<1x128x4xf32> to vector<128x4xf32>
    %c0_2 = arith.constant 0 : index
    %c0_3 = arith.constant 0 : index
    %c0_4 = arith.constant 0 : index
    %2 = vector.load %arg3[%c0_2, %c0_3, %c0_4] : memref<1x256x4xf32, #tpu.memory_space<vmem>>, vector<1x256x4xf32>
    %3 = vector.shape_cast %2 : vector<1x256x4xf32> to vector<256x4xf32>
    %cst = arith.constant dense<0.000000e+00> : vector<128x256xf32>
    %4 = tpu.matmul %1, %3, %cst {dimension_numbers = #tpu.dot_dimension_numbers<[1], [1], [0], [0], [0, 0, 1, 0], [], []>} : vector<128x4xf32>, vector<256x4xf32>, vector<128x256xf32> -> vector<128x256xf32>
    %cst_5 = arith.constant dense<0xFF800000> : vector<128xf32>
    %5 = vector.multi_reduction <maximumf>, %4, %cst_5 [1] : vector<128x256xf32> to vector<128xf32>
    %6 = vector.shape_cast %5 : vector<128xf32> to vector<128x1xf32>
    %7 = vector.broadcast %6 : vector<128x1xf32> to vector<128x256xf32>
    %8 = arith.subf %4, %7 : vector<128x256xf32>
    %9 = math.exp %8 : vector<128x256xf32>
    %cst_6 = arith.constant dense<0.000000e+00> : vector<128xf32>
    %10 = vector.multi_reduction <add>, %9, %cst_6 [1] : vector<128x256xf32> to vector<128xf32>
    %11 = vector.shape_cast %10 : vector<128xf32> to vector<128x1xf32>
    %12 = vector.broadcast %11 : vector<128x1xf32> to vector<128x256xf32>
    %13 = arith.divf %9, %12 : vector<128x256xf32>
    %c0_7 = arith.constant 0 : index
    %c0_8 = arith.constant 0 : index
    %c0_9 = arith.constant 0 : index
    %14 = vector.load %arg4[%c0_7, %c0_8, %c0_9] : memref<1x256x32xf32, #tpu.memory_space<vmem>>, vector<1x256x32xf32>
    %15 = vector.shape_cast %14 : vector<1x256x32xf32> to vector<256x32xf32>
    %cst_10 = arith.constant dense<0.000000e+00> : vector<128x32xf32>
    %16 = tpu.matmul %13, %15, %cst_10 {dimension_numbers = #tpu.dot_dimension_numbers<[1], [0], [0], [1], [0, 0, 1, 1], [], []>} : vector<128x256xf32>, vector<256x32xf32>, vector<128x32xf32> -> vector<128x32xf32>
    %c0_11 = arith.constant 0 : index
    %c0_12 = arith.constant 0 : index
    %c0_13 = arith.constant 0 : index
    %17 = vector.load %arg5[%c0_11, %c0_12, %c0_13] : memref<1x128x32xf32, #tpu.memory_space<vmem>>, vector<1x128x32xf32>
    %18 = vector.shape_cast %17 : vector<1x128x32xf32> to vector<128x32xf32>
    %19 = vector.shape_cast %16 : vector<128x32xf32> to vector<1x128x32xf32>
    tpu.vector_store %arg5[%c0_11, %c0_12, %c0_13], %19 {strides = array<i32>} : memref<1x128x32xf32, #tpu.memory_space<vmem>>, vector<1x128x32xf32>,
    %c0_14 = arith.constant 0 : index
    %c0_15 = arith.constant 0 : index
    %c0_16 = arith.constant 0 : index
    %20 = vector.load %arg6[%c0_14, %c0_15, %c0_16] : memref<1x128x256xf32, #tpu.memory_space<vmem>>, vector<1x128x256xf32>
    %21 = vector.shape_cast %20 : vector<1x128x256xf32> to vector<128x256xf32>
    %22 = vector.shape_cast %13 : vector<128x256xf32> to vector<1x128x256xf32>
    tpu.vector_store %arg6[%c0_14, %c0_15, %c0_16], %22 {strides = array<i32>} : memref<1x128x256xf32, #tpu.memory_space<vmem>>, vector<1x128x256xf32>,
    return
  }
  func.func @transform_0(%arg0: i32, %arg1: i32) -> (i32, i32, i32) {
    %c0_i32 = arith.constant 0 : i32
    %c0_i32_0 = arith.constant 0 : i32
    return %arg0, %arg1, %c0_i32 : i32, i32, i32
  }
  func.func @transform_1(%arg0: i32, %arg1: i32) -> (i32, i32, i32) {
    %c0_i32 = arith.constant 0 : i32
    %c0_i32_0 = arith.constant 0 : i32
    %c0_i32_1 = arith.constant 0 : i32
    return %arg0, %c0_i32, %c0_i32_0 : i32, i32, i32
  }
  func.func @transform_2(%arg0: i32, %arg1: i32) -> (i32, i32, i32) {
    %c0_i32 = arith.constant 0 : i32
    %c0_i32_0 = arith.constant 0 : i32
    %c0_i32_1 = arith.constant 0 : i32
    return %arg0, %c0_i32, %c0_i32_0 : i32, i32, i32
  }
  func.func @transform_3(%arg0: i32, %arg1: i32) -> (i32, i32, i32) {
    %c0_i32 = arith.constant 0 : i32
    %c0_i32_0 = arith.constant 0 : i32
    return %arg0, %arg1, %c0_i32 : i32, i32, i32
  }
  func.func @transform_4(%arg0: i32, %arg1: i32) -> (i32, i32, i32) {
    %c0_i32 = arith.constant 0 : i32
    %c0_i32_0 = arith.constant 0 : i32
    return %arg0, %arg1, %c0_i32 : i32, i32, i32
  }
}

</mosaic_0001>

<bundles_post_ra>
// kernel: tpu_custom_call.1
= control target key start
LH: loop header
LB: loop body
LE: loop exit
PB: predicated region body
PF: predicated region fallthrough
CT: control target
= control target key end

     0   :  { %10 = vsyncpa [#allocation3], 0  ;;  %s2434_s0 = inlined_call_operand.vmem [shape: f32[2,256,4], index: 0, kind: input, shape index: {}]   ;;  %s2435_s1 = inlined_call_operand.vmem [shape: f32[2,256,4], index: 1, kind: input, shape index: {}]   ;;  %s2436_s2 = inlined_call_operand.vmem [shape: f32[2,256,32], index: 2, kind: input, shape index: {}]   ;;  %s2437_s3 = inlined_call_operand.vmem [shape: f32[2,256,32], index: 3, kind: output, shape index: {0}]   ;;  %s2438_s4 = inlined_call_operand.hbm [shape: f32[2,256,256], index: 4, kind: output, shape index: {1}]  }
   0x1   :  { %12 = vsyncpa [#allocation3 + $0x1], 0  ;;  %s1793_s15 = smov 0   ;;  %s1795_s16 = smov 0  }
   0x2   :  { %s1797_s17 = smov 0   ;;  %s1799_s18 = smov 0  }
   0x3   :  { %s1801_s19 = smov 0   ;;  %s1803_s20 = smov 0  }
   0x4   :  { %s1805_s21 = smov 0   ;;  %s1807_s22 = smov 0  }
   0x5 LB: > { %s1284_s23 = sadd.s32 4294967295, %s1763_s22   ;;  %s1285_s24 = sadd.s32 4294967294, %s1763_s22   ;;  %s1763_s22 = sphi %s1807_s22, %s18_s22   ;;  %s1759_s21 = sphi %s1805_s21, %s2449_s21   ;;  %s1755_s20 = sphi %s1803_s20, %s2448_s20   ;;  %s1751_s19 = sphi %s1801_s19, %s2447_s19   ;;  %s1747_s18 = sphi %s1799_s18, %s2446_s18   ;;  %s1743_s17 = sphi %s1797_s17, %s2445_s17   ;;  %s1739_s16 = sphi %s1795_s16, %s2444_s16   ;;  %s1735_s15 = sphi %s1793_s15, %s2443_s15  }
   0x6   : > { %s27_s25 = sadd.s32 1, %s1755_s20  ;;  %s30_s26 = sadd.s32 1, %s1759_s21 }
   0x7   : > { %p28_p0 = scmp.ge.s32.totalorder %s27_s25, 2  ;;  %p157_p1 = scmp.ne.s32.totalorder %s1743_s17, %s1739_s16 }
   0x8   : > { %p158_p2 = scmp.eq.s32.totalorder %s1284_s23, 3  ;;  %p163_p5 = scmp.ne.s32.totalorder %s1739_s16, %s1735_s15 }
   0x9   : > { %s2451_s25 = smov (%p28_p0, %s27_s25), 0  ;;  %s2453_s26 = smov (!%p28_p0, %s30_s26), %s1759_s21 }
   0xa   : > { %s143_s27 = ssub.s32 %s1755_s20, %s2451_s25  ;;  %p1844_p3 = por %p158_p2, %p157_p1 }
   0xb   : > { %p32_p4 = scmp.ge.s32.totalorder %s2453_s26, 2  ;;  %p164_p6 = scmp.eq.s32.totalorder %s1285_s24, 3 }
   0xc   : > { %p1288_p7 = scmp.ge.s32.totalorder %s1763_s22, 1  ;;  %p211_p9 = scmp.lt.s32.totalorder %s1763_s22, 5 }
   0xd   : > { %s2455_s26 = smov (%p32_p4, %s2453_s26), 0  ;;  %p1853_p8 = por %p164_p6, %p163_p5 }
   0xe   : > { %s142_s30 = ssub.s32 %s1759_s21, %s2455_s26  ;;  %s147_s5 = sadd.s32 1, %s1743_s17 }
   0xf   : > { %s144_s6 = sor.u32 %s143_s27, %s142_s30  ;;  %p212_p10 = pnand %p1288_p7, %p211_p9 }
  0x10   : > { %p145_p11 = scmp.eq.s32.totalorder %s144_s6, 0  ;;  %p261_p12 = scmp.lt.s32.totalorder (!%p212_p10), %s1751_s19, 1 }
  0x11   : > { %215 = sbr.rel (%p212_p10) target bundleno = 860 (0x35c), region = 32  ;;  %s1290_s8 = sshll.u32 (!%p212_p10), %s1747_s18, 4 }
  0x12   : > { %s1862_s7 = scalar_select %p145_p11, %s1743_s17, %s147_s5  }
  0x13   : > { %p263_p13 = scmp.lt.s32.totalorder (!%p212_p10), %s1290_s8, 31  ;;  %s1357_s13 = sshll.u32 (!%p212_p10), %s1747_s18, 5 }
  0x14   : > { %s1765_s18 = smov (!%p212_p10), [#allocation2]  }
  0x16   : > { %s1867_s9 = scalar_select %p261_p12, %s1751_s19, 1  ;;  %vm339_vm0 = vcmask 31744  }
  0x17   : > { %s2457_s8 = smov (!%p263_p13, %s1290_s8), 31 }
  0x18   : > { %s1355_s10 = sshll.u32 %s1867_s9, 8  ;;  %s1291_s11 = sshll.u32 %s1867_s9, 5 }
  0x19   : > { %s1876_s14 = scalar_lea.vmem %s2435_s1, %s1355_s10  ;;  %s1882_s23 = sadd.s32 %s1291_s11, %s2457_s8 }
  0x1a   : > { %v338_v0 = vld [vmem:[%s1876_s14 + $0xf8] sm:$0xff]  ;;  %v337_v2 = vld [vmem:[%s1876_s14 + $0xf0] sm:$0xff]  ;;  %v336_v4 = vld [vmem:[%s1876_s14 + $0xe8] sm:$0xff]  ;;  %s2439_s24 = sshll.u32 %s1882_s23, 3  ;;  %s2101_s11 = scalar_lea.vmem %s2436_s2, %s1355_s10 }
  0x1b   : > { %v322_v1 = vld [vmem:[%s1876_s14 + $0x78] sm:$0xff]  ;;  %1358 = vmatprep.subr.msk.mxu0 %vm339_vm0, %v338_v0  ;;  %v321_v3 = vld [vmem:[%s1876_s14 + $0x70] sm:$0xff]  ;;  %v320_v5 = vld [vmem:[%s1876_s14 + $0x68] sm:$0xff]  ;;  %s1897_s5 = scalar_lea.vmem %s2434_s0, %s2439_s24  ;;  %s257_s9 = sand.u32 1, %s1739_s16  }
  0x1c   : > { %1359 = vmatpush3.xpose.msk.msra.mxu0 %vm339_vm0, %v322_v1  ;;  %v335_v6 = vld [vmem:[%s1876_s14 + $0xe0] sm:$0xff]  ;;  %v334_v9 = vld [vmem:[%s1876_s14 + $0xd8] sm:$0xff]  ;;  %v333_v11 = vld [vmem:[%s1876_s14 + $0xd0] sm:$0xff]  ;;  %s1289_s10 = sshll.u32 %s257_s9, 8 }
  0x1d   : > { %1360 = vmatprep.subr.msk.mxu0 %vm339_vm0, %v337_v2  ;;  %v291_v7 = vld [vmem:[%s1897_s5] sm:$0xff]  ;;  %v318_v10 = vld [vmem:[%s1876_s14 + $0x58] sm:$0xff]  ;;  %v317_v12 = vld [vmem:[%s1876_s14 + $0x50] sm:$0xff]  ;;  %s2268_s12 = scalar_lea.vmem [#allocation2], %s1289_s10  ;;  %s2344_s10 = scalar_lea.sflag [#allocation3], %s257_s9 }
  0x1e   : > { %v319_v8 = vld [vmem:[%s1876_s14 + $0x60] sm:$0xff]  ;;  %1390 = vmatprep.mubr.msk.f32.mxu0 %vm339_vm0, %v291_v7  ;;  %v332_v13 = vld [vmem:[%s1876_s14 + $0xc8] sm:$0xff]  ;;  %v330_v17 = vld [vmem:[%s1876_s14 + $0xb8] sm:$0xff] }
  0x1f   : > { %v316_v14 = vld [vmem:[%s1876_s14 + $0x48] sm:$0xff]  ;;  %v331_v15 = vld [vmem:[%s1876_s14 + $0xc0] sm:$0xff]  ;;  %v314_v18 = vld [vmem:[%s1876_s14 + $0x38] sm:$0xff] }
  0x20   : > { %1361 = vmatpush3.xpose.msk.msra.mxu0 %vm339_vm0, %v321_v3  ;;  %v315_v16 = vld [vmem:[%s1876_s14 + $0x40] sm:$0xff]  ;;  %v329_v19 = vld [vmem:[%s1876_s14 + $0xb0] sm:$0xff]  ;;  %v328_v21 = vld [vmem:[%s1876_s14 + $0xa8] sm:$0xff] }
  0x21   : > { %1362 = vmatprep.subr.msk.mxu0 %vm339_vm0, %v336_v4  ;;  %v313_v20 = vld [vmem:[%s1876_s14 + $0x30] sm:$0xff]  ;;  %v312_v22 = vld [vmem:[%s1876_s14 + $0x28] sm:$0xff]  ;;  %v327_v23 = vld [vmem:[%s1876_s14 + $0xa0] sm:$0xff] }
  0x22   : > { %v311_v24 = vld [vmem:[%s1876_s14 + $0x20] sm:$0xff]  ;;  %v326_v25 = vld [vmem:[%s1876_s14 + $0x98] sm:$0xff]  ;;  %v325_v27 = vld [vmem:[%s1876_s14 + $0x90] sm:$0xff] }
  0x23   : > { %v310_v26 = vld [vmem:[%s1876_s14 + $0x18] sm:$0xff]  ;;  %v309_v28 = vld [vmem:[%s1876_s14 + $0x10] sm:$0xff]  ;;  %v324_v29 = vld [vmem:[%s1876_s14 + $0x88] sm:$0xff] }
  0x24   : > { %1363 = vmatpush3.xpose.msk.msra.mxu0 %vm339_vm0, %v320_v5  ;;  %v308_v30 = vld [vmem:[%s1876_s14 + $0x8] sm:$0xff]  ;;  %v323_v31 = vld [vmem:[%s1876_s14 + $0x80] sm:$0xff]  ;;  %v293_v34 = vld [vmem:[%s1897_s5 + $0x10] sm:$0xff] }
  0x25   : > { %1364 = vmatprep.subr.msk.mxu0 %vm339_vm0, %v335_v6  ;;  %v307_v32 = vld [vmem:[%s1876_s14] sm:$0xff]  ;;  %v292_v33 = vld [vmem:[%s1897_s5 + $0x8] sm:$0xff]  ;;  %v294_v35 = vld [vmem:[%s1897_s5 + $0x18] sm:$0xff]  ;;  %s1351_s14 = sshll.u32 %s1751_s19, 6  ;;  %s1675_s19 = sshll.u32 %s1765_s18, 4  ;;  %s1676_s19 = int_to_ptr.vmem [resolvable:$false] %s1675_s19 }
  0x26   : > { %v295_v36 = vld [vmem:[%s1897_s5 + $0x20] sm:$0xff]  ;;  %v296_v37 = vld [vmem:[%s1897_s5 + $0x28] sm:$0xff]  ;;  %v297_v38 = vld [vmem:[%s1897_s5 + $0x30] sm:$0xff]  ;;  %s1138_s27 = sadd.s32 %s1357_s13, %s1351_s14 }
  0x27   : > { %v298_v39 = vld [vmem:[%s1897_s5 + $0x38] sm:$0xff]  ;;  %v299_v40 = vld [vmem:[%s1897_s5 + $0x40] sm:$0xff]  ;;  %v300_v41 = vld [vmem:[%s1897_s5 + $0x48] sm:$0xff]  ;;  %s1352_s30 = sshll.u32 %s1138_s27, 7 }
  0x28   : > { %1365 = vmatpush3.xpose.msk.msra.mxu0 %vm339_vm0, %v319_v8  ;;  %v301_v42 = vld [vmem:[%s1897_s5 + $0x50] sm:$0xff]  ;;  %v302_v43 = vld [vmem:[%s1897_s5 + $0x58] sm:$0xff]  ;;  %v303_v44 = vld [vmem:[%s1897_s5 + $0x60] sm:$0xff] }
  0x29   : > { %1366 = vmatprep.subr.msk.mxu0 %vm339_vm0, %v334_v9  ;;  %v304_v45 = vld [vmem:[%s1897_s5 + $0x68] sm:$0xff]  ;;  %v305_v46 = vld [vmem:[%s1897_s5 + $0x70] sm:$0xff]  ;;  %v306_v47 = vld [vmem:[%s1897_s5 + $0x78] sm:$0xff]  ;;  %s1141_s5 = sshll.u32 %s2268_s12, 4  ;;  %s2340_s5 = int_to_ptr.vmem [resolvable:$true] %s1141_s5 }
  0x2a   : > { %s1671_s24 = scalar_lea.vmem %s2340_s5, 4096  ;;  %p1678_p4 = scmp.lt.s32.totalorder %s2340_s5, %s1676_s19 }
  0x2b   : > { %p1672_p0 = scmp.ne.s32.totalorder %s2340_s5, %s1671_s24 }
  0x2c   : > { %1367 = vmatpush3.xpose.msk.msra.mxu0 %vm339_vm0, %v318_v10 }
  0x2d   : > { %1368 = vmatprep.subr.msk.mxu0 %vm339_vm0, %v333_v11  ;;  %p1673_p1 = pnand %p1672_p0, %p1844_p3 }
  0x2f   : > { %p1674_p2 = pneg %p1673_p1 }
  0x30   : > { %1369 = vmatpush3.xpose.msk.msra.mxu0 %vm339_vm0, %v317_v12 }
  0x31   : > { %1370 = vmatprep.subr.msk.mxu0 %vm339_vm0, %v332_v13 }
  0x34   : > { %1371 = vmatpush3.xpose.msk.msra.mxu0 %vm339_vm0, %v316_v14 }
  0x35   : > { %1372 = vmatprep.subr.msk.mxu0 %vm339_vm0, %v331_v15 }
  0x38   : > { %1373 = vmatpush3.xpose.msk.msra.mxu0 %vm339_vm0, %v315_v16 }
  0x39   : > { %1374 = vmatprep.subr.msk.mxu0 %vm339_vm0, %v330_v17 }
  0x3c   : > { %1375 = vmatpush3.xpose.msk.msra.mxu0 %vm339_vm0, %v314_v18 }
  0x3d   : > { %1376 = vmatprep.subr.msk.mxu0 %vm339_vm0, %v329_v19 }
  0x40   : > { %1377 = vmatpush3.xpose.msk.msra.mxu0 %vm339_vm0, %v313_v20 }
  0x41   : > { %1378 = vmatprep.subr.msk.mxu0 %vm339_vm0, %v328_v21 }
  0x44   : > { %1379 = vmatpush3.xpose.msk.msra.mxu0 %vm339_vm0, %v312_v22 }
  0x45   : > { %1380 = vmatprep.subr.msk.mxu0 %vm339_vm0, %v327_v23 }
  0x48   : > { %1381 = vmatpush3.xpose.msk.msra.mxu0 %vm339_vm0, %v311_v24 }
  0x49   : > { %1382 = vmatprep.subr.msk.mxu0 %vm339_vm0, %v326_v25 }
  0x4c   : > { %1383 = vmatpush3.xpose.msk.msra.mxu0 %vm339_vm0, %v310_v26 }
  0x4d   : > { %1384 = vmatprep.subr.msk.mxu0 %vm339_vm0, %v325_v27 }
  0x50   : > { %1385 = vmatpush3.xpose.msk.msra.mxu0 %vm339_vm0, %v309_v28 }
  0x51   : > { %1386 = vmatprep.subr.msk.mxu0 %vm339_vm0, %v324_v29 }
  0x54   : > { %1387 = vmatpush3.xpose.msk.msra.mxu0 %vm339_vm0, %v308_v30 }
  0x55   : > { %1388 = vmatprep.subr.msk.mxu0 %vm339_vm0, %v323_v31 }
  0x58   : > { %1389 = vmatpush3.xpose.msk.msra.mxu0 %vm339_vm0, %v307_v32  ;;  %v916_v32 = vld [vmem:[%s2101_s11 + $0xf8] sm:$0xff] }
  0x59   : > { %1422 = vmatprep.subr.mxu1 %v916_v32 }
  0x5b   : > { %1391 = vmatmul.mubr.msk.f32.vlgmr.msra.gmra.mxu0 %vm339_vm0, %v291_v7 }
  0x5c   : > { %1392 = vmatprep.mubr.msk.f32.mxu0 %vm339_vm0, %v292_v33 }
  0x5f   : > { %1393 = vmatmul.mubr.msk.f32.gmra.mxu0 %vm339_vm0, %v292_v33  ;;  %v900_v33 = vld [vmem:[%s2101_s11 + $0x78] sm:$0xff] }
  0x60   : > { %1394 = vmatprep.mubr.msk.f32.mxu0 %vm339_vm0, %v293_v34  ;;  %1423 = vmatpush3.msra.mxu1 %v900_v33 }
  0x63   : > { %1395 = vmatmul.mubr.msk.f32.gmra.mxu0 %vm339_vm0, %v293_v34  ;;  %v915_v34 = vld [vmem:[%s2101_s11 + $0xf0] sm:$0xff] }
  0x64   : > { %1396 = vmatprep.mubr.msk.f32.mxu0 %vm339_vm0, %v294_v35  ;;  %1424 = vmatprep.subr.mxu1 %v915_v34 }
  0x67   : > { %1397 = vmatmul.mubr.msk.f32.gmra.mxu0 %vm339_vm0, %v294_v35  ;;  %v899_v35 = vld [vmem:[%s2101_s11 + $0x70] sm:$0xff] }
  0x68   : > { %1398 = vmatprep.mubr.msk.f32.mxu0 %vm339_vm0, %v295_v36  ;;  %1425 = vmatpush3.msra.mxu1 %v899_v35 }
  0x6b   : > { %1399 = vmatmul.mubr.msk.f32.gmra.mxu0 %vm339_vm0, %v295_v36  ;;  %v914_v36 = vld [vmem:[%s2101_s11 + $0xe8] sm:$0xff] }
  0x6c   : > { %1400 = vmatprep.mubr.msk.f32.mxu0 %vm339_vm0, %v296_v37  ;;  %1426 = vmatprep.subr.mxu1 %v914_v36 }
  0x6f   : > { %1401 = vmatmul.mubr.msk.f32.gmra.mxu0 %vm339_vm0, %v296_v37  ;;  %v898_v37 = vld [vmem:[%s2101_s11 + $0x68] sm:$0xff] }
  0x70   : > { %1402 = vmatprep.mubr.msk.f32.mxu0 %vm339_vm0, %v297_v38  ;;  %1427 = vmatpush3.msra.mxu1 %v898_v37 }
  0x73   : > { %1403 = vmatmul.mubr.msk.f32.gmra.mxu0 %vm339_vm0, %v297_v38  ;;  %v913_v38 = vld [vmem:[%s2101_s11 + $0xe0] sm:$0xff] }
  0x74   : > { %1404 = vmatprep.mubr.msk.f32.mxu0 %vm339_vm0, %v298_v39  ;;  %1428 = vmatprep.subr.mxu1 %v913_v38 }
  0x77   : > { %1405 = vmatmul.mubr.msk.f32.gmra.mxu0 %vm339_vm0, %v298_v39  ;;  %v897_v39 = vld [vmem:[%s2101_s11 + $0x60] sm:$0xff] }
  0x78   : > { %1406 = vmatprep.mubr.msk.f32.mxu0 %vm339_vm0, %v299_v40  ;;  %1429 = vmatpush3.msra.mxu1 %v897_v39 }
  0x7b   : > { %1407 = vmatmul.mubr.msk.f32.gmra.mxu0 %vm339_vm0, %v299_v40  ;;  %v912_v40 = vld [vmem:[%s2101_s11 + $0xd8] sm:$0xff] }
  0x7c   : > { %1408 = vmatprep.mubr.msk.f32.mxu0 %vm339_vm0, %v300_v41  ;;  %1430 = vmatprep.subr.mxu1 %v912_v40 }
  0x7f   : > { %1409 = vmatmul.mubr.msk.f32.gmra.mxu0 %vm339_vm0, %v300_v41  ;;  %v896_v41 = vld [vmem:[%s2101_s11 + $0x58] sm:$0xff] }
  0x80   : > { %1410 = vmatprep.mubr.msk.f32.mxu0 %vm339_vm0, %v301_v42  ;;  %1431 = vmatpush3.msra.mxu1 %v896_v41 }
  0x83   : > { %1411 = vmatmul.mubr.msk.f32.gmra.mxu0 %vm339_vm0, %v301_v42  ;;  %v911_v42 = vld [vmem:[%s2101_s11 + $0xd0] sm:$0xff] }
  0x84   : > { %1412 = vmatprep.mubr.msk.f32.mxu0 %vm339_vm0, %v302_v43  ;;  %1432 = vmatprep.subr.mxu1 %v911_v42 }
  0x87   : > { %1413 = vmatmul.mubr.msk.f32.gmra.mxu0 %vm339_vm0, %v302_v43  ;;  %v895_v43 = vld [vmem:[%s2101_s11 + $0x50] sm:$0xff] }
  0x88   : > { %1414 = vmatprep.mubr.msk.f32.mxu0 %vm339_vm0, %v303_v44  ;;  %1433 = vmatpush3.msra.mxu1 %v895_v43 }
  0x8b   : > { %1415 = vmatmul.mubr.msk.f32.gmra.mxu0 %vm339_vm0, %v303_v44  ;;  %v910_v44 = vld [vmem:[%s2101_s11 + $0xc8] sm:$0xff] }
  0x8c   : > { %1416 = vmatprep.mubr.msk.f32.mxu0 %vm339_vm0, %v304_v45  ;;  %1434 = vmatprep.subr.mxu1 %v910_v44 }
  0x8f   : > { %1417 = vmatmul.mubr.msk.f32.gmra.mxu0 %vm339_vm0, %v304_v45  ;;  %v894_v45 = vld [vmem:[%s2101_s11 + $0x48] sm:$0xff] }
  0x90   : > { %1418 = vmatprep.mubr.msk.f32.mxu0 %vm339_vm0, %v305_v46  ;;  %1435 = vmatpush3.msra.mxu1 %v894_v45 }
  0x93   : > { %1419 = vmatmul.mubr.msk.f32.gmra.mxu0 %vm339_vm0, %v305_v46  ;;  %v909_v46 = vld [vmem:[%s2101_s11 + $0xc0] sm:$0xff] }
  0x94   : > { %1420 = vmatprep.mubr.msk.f32.mxu0 %vm339_vm0, %v306_v47  ;;  %1436 = vmatprep.subr.mxu1 %v909_v46 }
  0x97   : > { %1421 = vmatmul.mubr.msk.f32.gmra.mxu0 %vm339_vm0, %v306_v47 }
 0x11b   : > { %v2000_v48 = vpop.f32.mrf.mxu0 }
 0x11d   : > { %v2002_v49 = vpop.f32.mrf.mxu0 }
 0x11e   : > { %v645_v50 = vmax.f32 %v2000_v48, %v2002_v49 }
 0x11f   : > { %v2006_v51 = vpop.f32.mrf.mxu0 }
 0x120   : > { %646 = vmax.xlane.f32.xlu0 %v645_v50 }
 0x121   : > { %v2008_v52 = vpop.f32.mrf.mxu0 }
 0x122   : > { %v648_v53 = vmax.f32 %v2006_v51, %v2008_v52 }
 0x123   : > { %v2012_v54 = vpop.f32.mrf.mxu0 }
 0x124   : > { %649 = vmax.xlane.f32.xlu0 %v648_v53 }
 0x125   : > { %v2014_v55 = vpop.f32.mrf.mxu0 }
 0x126   : > { %v651_v56 = vmax.f32 %v2012_v54, %v2014_v55 }
 0x127   : > { %v2018_v57 = vpop.f32.mrf.mxu0 }
 0x128   : > { %652 = vmax.xlane.f32.xlu1 %v651_v56 }
 0x129   : > { %v2020_v58 = vpop.f32.mrf.mxu0 }
 0x12a   : > { %v654_v59 = vmax.f32 %v2018_v57, %v2020_v58 }
 0x12b   : > { %v2024_v60 = vpop.f32.mrf.mxu0 }
 0x12c   : > { %655 = vmax.xlane.f32.xlu1 %v654_v59 }
 0x12d   : > { %v2026_v61 = vpop.f32.mrf.mxu0 }
 0x12e   : > { %v657_v62 = vmax.f32 %v2024_v60, %v2026_v61 }
 0x12f   : > { %v2030_v63 = vpop.f32.mrf.mxu0 }
 0x130   : > { %658 = vmax.xlane.f32.xlu0 %v657_v62 }
 0x131   : > { %v2032_v0 = vpop.f32.mrf.mxu0 }
 0x132   : > { %v660_v1 = vmax.f32 %v2030_v63, %v2032_v0 }
 0x133   : > { %v2036_v2 = vpop.f32.mrf.mxu0 }
 0x134   : > { %661 = vmax.xlane.f32.xlu1 %v660_v1 }
 0x135   : > { %v2038_v3 = vpop.f32.mrf.mxu0 }
 0x136   : > { %v663_v4 = vmax.f32 %v2036_v2, %v2038_v3 }
 0x137   : > { %v2042_v5 = vpop.f32.mrf.mxu0 }
 0x138   : > { %664 = vmax.xlane.f32.xlu0 %v663_v4 }
 0x139   : > { %v2044_v6 = vpop.f32.mrf.mxu0 }
 0x13a   : > { %v666_v7 = vmax.f32 %v2042_v5, %v2044_v6 }
 0x13b   : > { %v2048_v8 = vpop.f32.mrf.mxu0 }
 0x13c   : > { %667 = vmax.xlane.f32.xlu1 %v666_v7 }
 0x13d   : > { %v2050_v9 = vpop.f32.mrf.mxu0 }
 0x13e   : > { %v669_v10 = vmax.f32 %v2048_v8, %v2050_v9 }
 0x13f   : > { %v2054_v11 = vpop.f32.mrf.mxu0 }
 0x140   : > { %670 = vmax.xlane.f32.xlu0 %v669_v10 }
 0x141   : > { %v2056_v12 = vpop.f32.mrf.mxu0 }
 0x142   : > { %v672_v13 = vmax.f32 %v2054_v11, %v2056_v12 }
 0x143   : > { %v2060_v14 = vpop.f32.mrf.mxu0 }
 0x144   : > { %673 = vmax.xlane.f32.xlu1 %v672_v13 }
 0x145   : > { %v2062_v15 = vpop.f32.mrf.mxu0 }
 0x146   : > { %v675_v16 = vmax.f32 %v2060_v14, %v2062_v15 }
 0x147   : > { %v2066_v17 = vpop.f32.mrf.mxu0 }
 0x148   : > { %676 = vmax.xlane.f32.xlu0 %v675_v16 }
 0x149   : > { %v2068_v18 = vpop.f32.mrf.mxu0 }
 0x14a   : > { %v678_v19 = vmax.f32 %v2066_v17, %v2068_v18 }
 0x14b   : > { %v2072_v20 = vpop.f32.mrf.mxu0 }
 0x14c   : > { %679 = vmax.xlane.f32.xlu1 %v678_v19 }
 0x14d   : > { %v2074_v21 = vpop.f32.mrf.mxu0 }
 0x14e   : > { %v681_v22 = vmax.f32 %v2072_v20, %v2074_v21 }
 0x14f   : > { %v2078_v23 = vpop.f32.mrf.mxu0 }
 0x150   : > { %682 = vmax.xlane.f32.xlu0 %v681_v22 }
 0x151   : > { %v2080_v24 = vpop.f32.mrf.mxu0 }
 0x152   : > { %v684_v25 = vmax.f32 %v2078_v23, %v2080_v24 }
 0x153   : > { %v2084_v26 = vpop.f32.mrf.mxu0 }
 0x154   : > { %685 = vmax.xlane.f32.xlu1 %v684_v25 }
 0x155   : > { %v2086_v27 = vpop.f32.mrf.mxu0 }
 0x156   : > { %v687_v28 = vmax.f32 %v2084_v26, %v2086_v27 }
 0x157   : > { %v2090_v29 = vpop.f32.mrf.mxu0 }
 0x158   : > { %688 = vmax.xlane.f32.xlu0 %v687_v28 }
 0x159   : > { %v2092_v30 = vpop.f32.mrf.mxu0 }
 0x15a   : > { %v690_v31 = vmax.f32 %v2090_v29, %v2092_v30 }
 0x15c   : > { %691 = vmax.xlane.f32.xlu1 %v690_v31 }
 0x1a9   : > { %v647_v47 = vpop.xlane.xlu0 %646 }
 0x1aa   : > { %v693_v50 = vsub.f32 %v2000_v48, %v647_v47  ;;  %v694_v53 = vsub.f32 %v2002_v49, %v647_v47 }
 0x1ac   : > { %v725_v56 = vmul.f32 1.442695, %v693_v50  ;;  %v727_v59 = vmul.f32 1.442695, %v694_v53 }
 0x1ad   : > { %v650_v62 = vpop.xlane.xlu0 %649 }
 0x1ae   : > { %1575 = vpow2.f32 %v725_v56  ;;  %v695_v1 = vsub.f32 %v2006_v51, %v650_v62  ;;  %v696_v4 = vsub.f32 %v2008_v52, %v650_v62  ;;  %v893_v62 = vld [vmem:[%s2101_s11 + $0x40] sm:$0xff] }
 0x1af   : > { %1577 = vpow2.f32 %v727_v59  ;;  %1437 = vmatpush3.msra.mxu1 %v893_v62 }
 0x1b0   : > { %v729_v7 = vmul.f32 1.442695, %v695_v1  ;;  %v731_v10 = vmul.f32 1.442695, %v696_v4 }
 0x1b1   : > { %v653_v13 = vpop.xlane.xlu1 %652 }
 0x1b2   : > { %1579 = vpow2.f32 %v729_v7  ;;  %v697_v16 = vsub.f32 %v2012_v54, %v653_v13  ;;  %v698_v19 = vsub.f32 %v2014_v55, %v653_v13  ;;  %v908_v7 = vld [vmem:[%s2101_s11 + $0xb8] sm:$0xff] }
 0x1b3   : > { %1581 = vpow2.f32 %v731_v10  ;;  %v892_v10 = vld [vmem:[%s2101_s11 + $0x38] sm:$0xff]  ;;  %1438 = vmatprep.subr.mxu1 %v908_v7 }
 0x1b4   : > { %v733_v48 = vmul.f32 1.442695, %v697_v16  ;;  %v735_v49 = vmul.f32 1.442695, %v698_v19  ;;  %1439 = vmatpush3.msra.mxu1 %v892_v10 }
 0x1b5   : > { %v656_v22 = vpop.xlane.xlu1 %655 }
 0x1b6   : > { %1583 = vpow2.f32 %v733_v48  ;;  %v699_v25 = vsub.f32 %v2018_v57, %v656_v22  ;;  %v700_v51 = vsub.f32 %v2020_v58, %v656_v22  ;;  %v891_v22 = vld [vmem:[%s2101_s11 + $0x30] sm:$0xff] }
 0x1b7   : > { %1585 = vpow2.f32 %v735_v49 }
 0x1b8   : > { %v737_v52 = vmul.f32 1.442695, %v699_v25  ;;  %v739_v28 = vmul.f32 1.442695, %v700_v51  ;;  %v890_v51 = vld [vmem:[%s2101_s11 + $0x28] sm:$0xff] }
 0x1b9   : > { %v659_v31 = vpop.xlane.xlu0 %658 }
 0x1ba   : > { %1587 = vpow2.f32 %v737_v52  ;;  %v701_v32 = vsub.f32 %v2024_v60, %v659_v31  ;;  %v702_v54 = vsub.f32 %v2026_v61, %v659_v31  ;;  %v905_v52 = vld [vmem:[%s2101_s11 + $0xa0] sm:$0xff] }
 0x1bb   : > { %v2128_v33 = vpop.eup %1575  ;;  %1589 = vpow2.f32 %v739_v28 }
 0x1bc   : > { %v2130_v55 = vpop.eup %1577  ;;  %v741_v34 = vmul.f32 1.442695, %v701_v32  ;;  %v743_v35 = vmul.f32 1.442695, %v702_v54 }
 0x1bd   : > { %v662_v36 = vpop.xlane.xlu1 %661  ;;  %v789_v57 = vadd.f32 %v2130_v55, %v2128_v33 }
 0x1be   : > { %1591 = vpow2.f32 %v741_v34  ;;  %v703_v58 = vsub.f32 %v2030_v63, %v662_v36  ;;  %v704_v37 = vsub.f32 %v2032_v0, %v662_v36  ;;  %v889_v36 = vld [vmem:[%s2101_s11 + $0x20] sm:$0xff] }
 0x1bf   : > { %v2136_v38 = vpop.eup %1579  ;;  %1593 = vpow2.f32 %v743_v35  ;;  %790 = vadd.xlane.f32.xlu0 %v789_v57 }
 0x1c0   : > { %v2138_v60 = vpop.eup %1581  ;;  %v745_v61 = vmul.f32 1.442695, %v703_v58  ;;  %v747_v39 = vmul.f32 1.442695, %v704_v37  ;;  %v888_v58 = vld [vmem:[%s2101_s11 + $0x18] sm:$0xff]  ;;  %v903_v37 = vld [vmem:[%s2101_s11 + $0x90] sm:$0xff] }
 0x1c1   : > { %v665_v40 = vpop.xlane.xlu0 %664  ;;  %v792_v41 = vadd.f32 %v2138_v60, %v2136_v38 }
 0x1c2   : > { %1595 = vpow2.f32 %v745_v61  ;;  %v705_v42 = vsub.f32 %v2036_v2, %v665_v40  ;;  %v706_v43 = vsub.f32 %v2038_v3, %v665_v40 }
 0x1c3   : > { %v2144_v63 = vpop.eup %1583  ;;  %1597 = vpow2.f32 %v747_v39  ;;  %793 = vadd.xlane.f32.xlu1 %v792_v41 }
 0x1c4   : > { %v2146_v0 = vpop.eup %1585  ;;  %v749_v44 = vmul.f32 1.442695, %v705_v42  ;;  %v751_v45 = vmul.f32 1.442695, %v706_v43 }
 0x1c5   : > { %v668_v46 = vpop.xlane.xlu1 %667  ;;  %v795_v47 = vadd.f32 %v2146_v0, %v2144_v63 }
 0x1c6   : > { %1599 = vpow2.f32 %v749_v44  ;;  %v707_v2 = vsub.f32 %v2042_v5, %v668_v46  ;;  %v708_v3 = vsub.f32 %v2044_v6, %v668_v46  ;;  %v907_v5 = vld [vmem:[%s2101_s11 + $0xb0] sm:$0xff]  ;;  %v886_v46 = vld [vmem:[%s2101_s11 + $0x8] sm:$0xff] }
 0x1c7   : > { %v2152_v50 = vpop.eup %1587  ;;  %1601 = vpow2.f32 %v751_v45  ;;  %796 = vadd.xlane.f32.xlu0 %v795_v47  ;;  %1440 = vmatprep.subr.mxu1 %v907_v5  ;;  %v887_v44 = vld [vmem:[%s2101_s11 + $0x10] sm:$0xff]  ;;  %v901_v47 = vld [vmem:[%s2101_s11 + $0x80] sm:$0xff] }
 0x1c8   : > { %v2154_v53 = vpop.eup %1589  ;;  %v753_v56 = vmul.f32 1.442695, %v707_v2  ;;  %v755_v59 = vmul.f32 1.442695, %v708_v3  ;;  %1441 = vmatpush3.msra.mxu1 %v891_v22 }
 0x1c9   : > { %v671_v1 = vpop.xlane.xlu0 %670  ;;  %v798_v4 = vadd.f32 %v2154_v53, %v2152_v50 }
 0x1ca   : > { %1603 = vpow2.f32 %v753_v56  ;;  %v709_v6 = vsub.f32 %v2048_v8, %v671_v1  ;;  %v710_v13 = vsub.f32 %v2050_v9, %v671_v1  ;;  %v906_v9 = vld [vmem:[%s2101_s11 + $0xa8] sm:$0xff] }
 0x1cb   : > { %v2164_v16 = vpop.eup %1591  ;;  %1605 = vpow2.f32 %v755_v59  ;;  %799 = vadd.xlane.f32.xlu1 %v798_v4  ;;  %1442 = vmatprep.subr.mxu1 %v906_v9  ;;  %v885_v4 = vld [vmem:[%s2101_s11] sm:$0xff] }
 0x1cc   : > { %v2166_v19 = vpop.eup %1593  ;;  %v757_v48 = vmul.f32 1.442695, %v709_v6  ;;  %v759_v49 = vmul.f32 1.442695, %v710_v13  ;;  %1443 = vmatpush3.msra.mxu1 %v890_v51 }
 0x1cd   : > { %v674_v25 = vpop.xlane.xlu1 %673  ;;  %v801_v8 = vadd.f32 %v2166_v19, %v2164_v16  ;;  %1444 = vmatprep.subr.mxu1 %v905_v52 }
 0x1ce   : > { %1607 = vpow2.f32 %v757_v48  ;;  %v711_v28 = vsub.f32 %v2054_v11, %v674_v25  ;;  %v712_v31 = vsub.f32 %v2056_v12, %v674_v25  ;;  %1445 = vmatpush3.msra.mxu1 %v889_v36  ;;  %v904_v12 = vld [vmem:[%s2101_s11 + $0x98] sm:$0xff] }
 0x1cf   : > { %v2176_v32 = vpop.eup %1595  ;;  %1609 = vpow2.f32 %v759_v49  ;;  %802 = vadd.xlane.f32.xlu0 %v801_v8  ;;  %1446 = vmatprep.subr.mxu1 %v904_v12 }
 0x1d0   : > { %v2178_v54 = vpop.eup %1597  ;;  %v761_v34 = vmul.f32 1.442695, %v711_v28  ;;  %v763_v35 = vmul.f32 1.442695, %v712_v31  ;;  %1447 = vmatpush3.msra.mxu1 %v888_v58 }
 0x1d1   : > { %v677_v57 = vpop.xlane.xlu0 %676  ;;  %v804_v11 = vadd.f32 %v2178_v54, %v2176_v32  ;;  %1448 = vmatprep.subr.mxu1 %v903_v37 }
 0x1d2   : > { %1611 = vpow2.f32 %v761_v34  ;;  %v713_v61 = vsub.f32 %v2060_v14, %v677_v57  ;;  %v714_v39 = vsub.f32 %v2062_v15, %v677_v57  ;;  %1449 = vmatpush3.msra.mxu1 %v887_v44  ;;  %v902_v15 = vld [vmem:[%s2101_s11 + $0x88] sm:$0xff]  ;;  %s2338_s11 = scalar_lea.hbm %s2438_s4, %s1352_s30 }
 0x1d3   : > { %v2188_v40 = vpop.eup %1599  ;;  %1613 = vpow2.f32 %v763_v35  ;;  %805 = vadd.xlane.f32.xlu1 %v804_v11  ;;  %1450 = vmatprep.subr.mxu1 %v902_v15 }
 0x1d4   : > { %v2190_v41 = vpop.eup %1601  ;;  %v765_v42 = vmul.f32 1.442695, %v713_v61  ;;  %v767_v43 = vmul.f32 1.442695, %v714_v39  ;;  %1451 = vmatpush3.msra.mxu1 %v886_v46 }
 0x1d5   : > { %v680_v45 = vpop.xlane.xlu1 %679  ;;  %v807_v14 = vadd.f32 %v2190_v41, %v2188_v40  ;;  %1452 = vmatprep.subr.mxu1 %v901_v47 }
 0x1d6   : > { %1615 = vpow2.f32 %v765_v42  ;;  %v715_v2 = vsub.f32 %v2066_v17, %v680_v45  ;;  %v716_v3 = vsub.f32 %v2068_v18, %v680_v45  ;;  %1453 = vmatpush3.msra.mxu1 %v885_v4 }
 0x1d7   : > { %v2200_v56 = vpop.eup %1603  ;;  %1617 = vpow2.f32 %v767_v43  ;;  %808 = vadd.xlane.f32.xlu0 %v807_v14 }
 0x1d8   : > { %v2202_v59 = vpop.eup %1605  ;;  %v769_v62 = vmul.f32 1.442695, %v715_v2  ;;  %v771_v1 = vmul.f32 1.442695, %v716_v3 }
 0x1d9   : > { %v683_v7 = vpop.xlane.xlu0 %682  ;;  %v810_v10 = vadd.f32 %v2202_v59, %v2200_v56 }
 0x1da   : > { %1619 = vpow2.f32 %v769_v62  ;;  %v717_v17 = vsub.f32 %v2072_v20, %v683_v7  ;;  %v718_v18 = vsub.f32 %v2074_v21, %v683_v7 }
 0x1db   : > { %v2209_v5 = vpop.eup %1607  ;;  %1621 = vpow2.f32 %v771_v1  ;;  %811 = vadd.xlane.f32.xlu1 %v810_v10 }
 0x1dc   : > { %v2211_v6 = vpop.eup %1609  ;;  %v773_v13 = vmul.f32 1.442695, %v717_v17  ;;  %v775_v48 = vmul.f32 1.442695, %v718_v18 }
 0x1dd   : > { %v686_v49 = vpop.xlane.xlu1 %685  ;;  %v813_v22 = vadd.f32 %v2211_v6, %v2209_v5 }
 0x1de   : > { %1623 = vpow2.f32 %v773_v13  ;;  %v719_v25 = vsub.f32 %v2078_v23, %v686_v49  ;;  %v720_v8 = vsub.f32 %v2080_v24, %v686_v49 }
 0x1df   : > { %v2217_v20 = vpop.eup %1611  ;;  %1625 = vpow2.f32 %v775_v48  ;;  %814 = vadd.xlane.f32.xlu0 %v813_v22 }
 0x1e0   : > { %v2219_v21 = vpop.eup %1613  ;;  %v777_v9 = vmul.f32 1.442695, %v719_v25  ;;  %v779_v51 = vmul.f32 1.442695, %v720_v8 }
 0x1e1   : > { %v689_v52 = vpop.xlane.xlu0 %688  ;;  %v816_v28 = vadd.f32 %v2219_v21, %v2217_v20 }
 0x1e2   : > { %1627 = vpow2.f32 %v777_v9  ;;  %v721_v31 = vsub.f32 %v2084_v26, %v689_v52  ;;  %v722_v34 = vsub.f32 %v2086_v27, %v689_v52 }
 0x1e3   : > { %v2225_v23 = vpop.eup %1615  ;;  %1629 = vpow2.f32 %v779_v51  ;;  %817 = vadd.xlane.f32.xlu1 %v816_v28 }
 0x1e4   : > { %v2227_v24 = vpop.eup %1617  ;;  %v781_v35 = vmul.f32 1.442695, %v721_v31  ;;  %v783_v36 = vmul.f32 1.442695, %v722_v34 }
 0x1e5   : > { %v692_v57 = vpop.xlane.xlu1 %691  ;;  %v819_v11 = vadd.f32 %v2227_v24, %v2225_v23 }
 0x1e6   : > { %1631 = vpow2.f32 %v781_v35  ;;  %v723_v12 = vsub.f32 %v2090_v29, %v692_v57  ;;  %v724_v58 = vsub.f32 %v2092_v30, %v692_v57 }
 0x1e7   : > { %v2233_v26 = vpop.eup %1619  ;;  %1633 = vpow2.f32 %v783_v36  ;;  %820 = vadd.xlane.f32.xlu0 %v819_v11 }
 0x1e8   : > { %v2235_v27 = vpop.eup %1621  ;;  %v785_v37 = vmul.f32 1.442695, %v723_v12  ;;  %v787_v61 = vmul.f32 1.442695, %v724_v58 }
 0x1e9   : > { %v822_v39 = vadd.f32 %v2235_v27, %v2233_v26 }
 0x1ea   : > { %1635 = vpow2.f32 %v785_v37 }
 0x1eb   : > { %v2239_v42 = vpop.eup %1623  ;;  %1637 = vpow2.f32 %v787_v61  ;;  %823 = vadd.xlane.f32.xlu1 %v822_v39 }
 0x1ec   : > { %v2241_v43 = vpop.eup %1625 }
 0x1ed   : > { %v825_v29 = vadd.f32 %v2241_v43, %v2239_v42 }
 0x1ef   : > { %v2245_v30 = vpop.eup %1627  ;;  %826 = vadd.xlane.f32.xlu0 %v825_v29 }
 0x1f0   : > { %v2247_v44 = vpop.eup %1629 }
 0x1f1   : > { %v828_v45 = vadd.f32 %v2247_v44, %v2245_v30 }
 0x1f3   : > { %v2251_v14 = vpop.eup %1631  ;;  %829 = vadd.xlane.f32.xlu1 %v828_v45 }
 0x1f4   : > { %v2253_v15 = vpop.eup %1633 }
 0x1f5   : > { %v831_v46 = vadd.f32 %v2253_v15, %v2251_v14 }
 0x1f7   : > { %v2257_v47 = vpop.eup %1635  ;;  %832 = vadd.xlane.f32.xlu0 %v831_v46 }
 0x1f8   : > { %v2259_v2 = vpop.eup %1637 }
 0x1f9   : > { %v834_v3 = vadd.f32 %v2259_v2, %v2257_v47 }
 0x1fb   : > { %835 = vadd.xlane.f32.xlu1 %v834_v3 }
 0x248   : > { %v791_v62 = vpop.xlane.xlu0 %790 }
 0x249   : > { %1639 = vrcp.f32 %v791_v62 }
 0x24c   : > { %v794_v1 = vpop.xlane.xlu1 %793 }
 0x24d   : > { %1641 = vrcp.f32 %v794_v1 }
 0x250   : > { %v797_v4 = vpop.xlane.xlu0 %796 }
 0x251   : > { %1643 = vrcp.f32 %v797_v4 }
 0x254   : > { %v800_v7 = vpop.xlane.xlu1 %799 }
 0x255   : > { %1645 = vrcp.f32 %v800_v7 }
 0x256   : > { %v1640_v10 = vpop.eup %1639 }
 0x257   : > { %v839_v17 = vmul.f32 %v1640_v10, %v2130_v55  ;;  %v838_v18 = vmul.f32 %v1640_v10, %v2128_v33 }
 0x258   : > { %v803_v13 = vpop.xlane.xlu0 %802 }
 0x259   : > { %1647 = vrcp.f32 %v803_v13  ;;  %981 = vmatprep.mubr.f32.mxu1 %v839_v17  ;;  %1080 = vst [vmem:[%s2268_s12 + $0x8] sm:$0xff] %v839_v17  ;;  %1079 = vst [vmem:[%s2268_s12] sm:$0xff] %v838_v18 }
 0x25a   : > { %v1642_v48 = vpop.eup %1641  ;;  %982 = vmatmul.mubr.f32.vlgmr.msra.gmra.mxu1 %v838_v18 }
 0x25b   : > { %v842_v49 = vmul.f32 %v1642_v48, %v2138_v60  ;;  %v841_v55 = vmul.f32 %v1642_v48, %v2136_v38 }
 0x25c   : > { %v806_v33 = vpop.xlane.xlu1 %805 }
 0x25d   : > { %1649 = vrcp.f32 %v806_v33  ;;  %986 = vmatprep.mubr.f32.mxu1 %v842_v49  ;;  %1082 = vst [vmem:[%s2268_s12 + $0x18] sm:$0xff] %v842_v49  ;;  %1081 = vst [vmem:[%s2268_s12 + $0x10] sm:$0xff] %v841_v55 }
 0x25e   : > { %v1644_v22 = vpop.eup %1643  ;;  %987 = vmatmul.mubr.f32.gmra.mxu1 %v841_v55 }
 0x25f   : > { %v845_v25 = vmul.f32 %v1644_v22, %v2146_v0  ;;  %v844_v8 = vmul.f32 %v1644_v22, %v2144_v63 }
 0x260   : > { %v809_v9 = vpop.xlane.xlu0 %808 }
 0x261   : > { %1651 = vrcp.f32 %v809_v9  ;;  %991 = vmatprep.mubr.f32.mxu1 %v845_v25  ;;  %1084 = vst [vmem:[%s2268_s12 + $0x28] sm:$0xff] %v845_v25  ;;  %1083 = vst [vmem:[%s2268_s12 + $0x20] sm:$0xff] %v844_v8 }
 0x262   : > { %v1646_v60 = vpop.eup %1645  ;;  %992 = vmatmul.mubr.f32.gmra.mxu1 %v844_v8 }
 0x263   : > { %v848_v38 = vmul.f32 %v1646_v60, %v2154_v53  ;;  %v847_v51 = vmul.f32 %v1646_v60, %v2152_v50 }
 0x264   : > { %v812_v52 = vpop.xlane.xlu1 %811 }
 0x265   : > { %1653 = vrcp.f32 %v812_v52  ;;  %996 = vmatprep.mubr.f32.mxu1 %v848_v38  ;;  %1086 = vst [vmem:[%s2268_s12 + $0x38] sm:$0xff] %v848_v38  ;;  %1085 = vst [vmem:[%s2268_s12 + $0x30] sm:$0xff] %v847_v51 }
 0x266   : > { %v1648_v0 = vpop.eup %1647  ;;  %997 = vmatmul.mubr.f32.gmra.mxu1 %v847_v51 }
 0x267   : > { %v851_v63 = vmul.f32 %v1648_v0, %v2166_v19  ;;  %v850_v28 = vmul.f32 %v1648_v0, %v2164_v16 }
 0x268   : > { %v815_v31 = vpop.xlane.xlu0 %814 }
 0x269   : > { %1655 = vrcp.f32 %v815_v31  ;;  %1001 = vmatprep.mubr.f32.mxu1 %v851_v63  ;;  %1088 = vst [vmem:[%s2268_s12 + $0x48] sm:$0xff] %v851_v63  ;;  %1087 = vst [vmem:[%s2268_s12 + $0x40] sm:$0xff] %v850_v28 }
 0x26a   : > { %v1650_v53 = vpop.eup %1649  ;;  %1002 = vmatmul.mubr.f32.gmra.mxu1 %v850_v28 }
 0x26b   : > { %v854_v50 = vmul.f32 %v1650_v53, %v2178_v54  ;;  %v853_v34 = vmul.f32 %v1650_v53, %v2176_v32 }
 0x26c   : > { %v818_v35 = vpop.xlane.xlu1 %817 }
 0x26d   : > { %1657 = vrcp.f32 %v818_v35  ;;  %1006 = vmatprep.mubr.f32.mxu1 %v854_v50  ;;  %1090 = vst [vmem:[%s2268_s12 + $0x58] sm:$0xff] %v854_v50  ;;  %1089 = vst [vmem:[%s2268_s12 + $0x50] sm:$0xff] %v853_v34 }
 0x26e   : > { %v1652_v19 = vpop.eup %1651  ;;  %1007 = vmatmul.mubr.f32.gmra.mxu1 %v853_v34 }
 0x26f   : > { %v857_v16 = vmul.f32 %v1652_v19, %v2190_v41  ;;  %v856_v36 = vmul.f32 %v1652_v19, %v2188_v40 }
 0x270   : > { %v821_v57 = vpop.xlane.xlu0 %820 }
 0x271   : > { %1659 = vrcp.f32 %v821_v57  ;;  %1011 = vmatprep.mubr.f32.mxu1 %v857_v16  ;;  %1092 = vst [vmem:[%s2268_s12 + $0x68] sm:$0xff] %v857_v16  ;;  %1091 = vst [vmem:[%s2268_s12 + $0x60] sm:$0xff] %v856_v36 }
 0x272   : > { %v1654_v54 = vpop.eup %1653  ;;  %1012 = vmatmul.mubr.f32.gmra.mxu1 %v856_v36 }
 0x273   : > { %v860_v32 = vmul.f32 %v1654_v54, %v2202_v59  ;;  %v859_v11 = vmul.f32 %v1654_v54, %v2200_v56 }
 0x274   : > { %v824_v12 = vpop.xlane.xlu1 %823 }
 0x275   : > { %1661 = vrcp.f32 %v824_v12  ;;  %1016 = vmatprep.mubr.f32.mxu1 %v860_v32  ;;  %1094 = vst [vmem:[%s2268_s12 + $0x78] sm:$0xff] %v860_v32  ;;  %1093 = vst [vmem:[%s2268_s12 + $0x70] sm:$0xff] %v859_v11 }
 0x276   : > { %v1656_v41 = vpop.eup %1655  ;;  %1017 = vmatmul.mubr.f32.gmra.mxu1 %v859_v11 }
 0x277   : > { %v863_v40 = vmul.f32 %v1656_v41, %v2211_v6  ;;  %v862_v58 = vmul.f32 %v1656_v41, %v2209_v5 }
 0x278   : > { %v827_v37 = vpop.xlane.xlu0 %826 }
 0x279   : > { %1663 = vrcp.f32 %v827_v37  ;;  %1021 = vmatprep.mubr.f32.mxu1 %v863_v40  ;;  %1096 = vst [vmem:[%s2268_s12 + $0x88] sm:$0xff] %v863_v40  ;;  %1095 = vst [vmem:[%s2268_s12 + $0x80] sm:$0xff] %v862_v58 }
 0x27a   : > { %v1658_v59 = vpop.eup %1657  ;;  %1022 = vmatmul.mubr.f32.gmra.mxu1 %v862_v58 }
 0x27b   : > { %v866_v56 = vmul.f32 %v1658_v59, %v2219_v21  ;;  %v865_v61 = vmul.f32 %v1658_v59, %v2217_v20 }
 0x27c   : > { %v830_v39 = vpop.xlane.xlu1 %829 }
 0x27d   : > { %1665 = vrcp.f32 %v830_v39  ;;  %1026 = vmatprep.mubr.f32.mxu1 %v866_v56  ;;  %1098 = vst [vmem:[%s2268_s12 + $0x98] sm:$0xff] %v866_v56  ;;  %1097 = vst [vmem:[%s2268_s12 + $0x90] sm:$0xff] %v865_v61 }
 0x27e   : > { %v1660_v6 = vpop.eup %1659  ;;  %1027 = vmatmul.mubr.f32.gmra.mxu1 %v865_v61 }
 0x27f   : > { %v869_v5 = vmul.f32 %v1660_v6, %v2227_v24  ;;  %v868_v29 = vmul.f32 %v1660_v6, %v2225_v23 }
 0x280   : > { %v833_v45 = vpop.xlane.xlu0 %832 }
 0x281   : > { %1667 = vrcp.f32 %v833_v45  ;;  %1031 = vmatprep.mubr.f32.mxu1 %v869_v5  ;;  %1100 = vst [vmem:[%s2268_s12 + $0xa8] sm:$0xff] %v869_v5  ;;  %1099 = vst [vmem:[%s2268_s12 + $0xa0] sm:$0xff] %v868_v29 }
 0x282   : > { %v1662_v20 = vpop.eup %1661  ;;  %1032 = vmatmul.mubr.f32.gmra.mxu1 %v868_v29 }
 0x283   : > { %v872_v21 = vmul.f32 %v1662_v20, %v2235_v27  ;;  %v871_v46 = vmul.f32 %v1662_v20, %v2233_v26 }
 0x284   : > { %v836_v3 = vpop.xlane.xlu1 %835 }
 0x285   : > { %1669 = vrcp.f32 %v836_v3  ;;  %1036 = vmatprep.mubr.f32.mxu1 %v872_v21  ;;  %1102 = vst [vmem:[%s2268_s12 + $0xb8] sm:$0xff] %v872_v21  ;;  %1101 = vst [vmem:[%s2268_s12 + $0xb0] sm:$0xff] %v871_v46 }
 0x286   : > { %v1664_v23 = vpop.eup %1663  ;;  %1037 = vmatmul.mubr.f32.gmra.mxu1 %v871_v46 }
 0x287   : > { %v875_v24 = vmul.f32 %v1664_v23, %v2241_v43  ;;  %v874_v62 = vmul.f32 %v1664_v23, %v2239_v42 }
 0x289   : > { %1041 = vmatprep.mubr.f32.mxu1 %v875_v24  ;;  %1104 = vst [vmem:[%s2268_s12 + $0xc8] sm:$0xff] %v875_v24  ;;  %1103 = vst [vmem:[%s2268_s12 + $0xc0] sm:$0xff] %v874_v62 }
 0x28a   : > { %v1666_v27 = vpop.eup %1665  ;;  %1042 = vmatmul.mubr.f32.gmra.mxu1 %v874_v62 }
 0x28b   : > { %v878_v26 = vmul.f32 %v1666_v27, %v2247_v44  ;;  %v877_v1 = vmul.f32 %v1666_v27, %v2245_v30 }
 0x28d   : > { %1046 = vmatprep.mubr.f32.mxu1 %v878_v26  ;;  %1106 = vst [vmem:[%s2268_s12 + $0xd8] sm:$0xff] %v878_v26  ;;  %1105 = vst [vmem:[%s2268_s12 + $0xd0] sm:$0xff] %v877_v1 }
 0x28e   : > { %v1668_v43 = vpop.eup %1667  ;;  %1047 = vmatmul.mubr.f32.gmra.mxu1 %v877_v1 }
 0x28f   : > { %v881_v42 = vmul.f32 %v1668_v43, %v2253_v15  ;;  %v880_v4 = vmul.f32 %v1668_v43, %v2251_v14 }
 0x291   : > { %1051 = vmatprep.mubr.f32.mxu1 %v881_v42  ;;  %1108 = vst [vmem:[%s2268_s12 + $0xe8] sm:$0xff] %v881_v42  ;;  %1107 = vst [vmem:[%s2268_s12 + $0xe0] sm:$0xff] %v880_v4 }
 0x292   : > { %v1670_v44 = vpop.eup %1669  ;;  %1052 = vmatmul.mubr.f32.gmra.mxu1 %v880_v4 }
 0x293   : > { %v884_v30 = vmul.f32 %v1670_v44, %v2259_v2  ;;  %v883_v7 = vmul.f32 %v1670_v44, %v2257_v47 }
 0x295   : > { %1056 = vmatprep.mubr.f32.mxu1 %v884_v30  ;;  %1110 = vst [vmem:[%s2268_s12 + $0xf8] sm:$0xff] %v884_v30  ;;  %1109 = vst [vmem:[%s2268_s12 + $0xf0] sm:$0xff] %v883_v7  ;;  %s1677_s12 = scalar_lea.vmem %s1676_s19, 8192 }
 0x296   : > { %1057 = vmatmul.mubr.f32.gmra.mxu1 %v883_v7  ;;  %p1679_p5 = scmp.lt.s32.totalorder %s1677_s12, %s1671_s24 }
 0x298   : > { %p1680_p6 = por %p1679_p5, %p1678_p4 }
 0x29a   : > { %p1681_p7 = pnand %p1680_p6, %p1674_p2 }
 0x29c   : > { %1684 = shalt.err (!%p1681_p7)
}
 0x29d   : > { %s1685_s9 = scalar_lea.hbm %s2338_s11, 4096  ;;  %s1689_s27 = scalar_lea.hbm %s2438_s4, 16384 }
 0x29e   : > { %p1686_p9 = scmp.ne.s32.totalorder %s2338_s11, %s1685_s9  ;;  %p1690_p12 = scmp.lt.s32.totalorder %s2338_s11, %s2438_s4 }
 0x29f   : > { %p1691_p13 = scmp.lt.s32.totalorder %s1689_s27, %s1685_s9 }
 0x2a0   : > { %p1687_p10 = pnand %p1686_p9, %p1844_p3 }
 0x2a1   : > { %p1692_p0 = por %p1691_p13, %p1690_p12 }
 0x2a2   : > { %p1688_p11 = pneg %p1687_p10 }
 0x2a4   : > { %p1693_p1 = pnand %p1692_p0, %p1688_p11 }
 0x2a6   : > { %1696 = shalt.err (!%p1693_p1)
}
 0x2a7   : > { %s1766_s24 = smov 256   ;;  %s1767_s8 = smov 16   ;;  %vm1062_vm1 = vcmask 261120  }
 0x2a8   : > { %1502 = dma.vmem_to_hbm [thread:$0]  (%p1844_p3), %s2340_s5, 4096, %s2338_s11, %s2344_s10, %s1766_s24, %s1766_s24, %s1767_s8  }
 0x2a9   : > { %s2442_s18 = sshll.u32 %s1882_s23, 3 }
 0x2aa   : > { %s2372_s13 = scalar_lea.vmem %s2437_s3, %s2442_s18 }
 0x31a   : > { %v1454_v14 = vpop.f32.mrf.mxu1 }
 0x31c   : > { %v1455_v15 = vpop.f32.mrf.mxu1 }
 0x31d   : > { %v1456_v47 = vadd.f32 %v1455_v15, %v1454_v14 }
 0x31e   : > { %v1457_v2 = vpop.f32.mrf.mxu1 }
 0x31f   : > { %1063 = vst.msk [vmem:[%s2372_s13] sm:$0xff] %vm1062_vm1, %v1456_v47 }
 0x320   : > { %v1458_v10 = vpop.f32.mrf.mxu1 }
 0x321   : > { %v1459_v17 = vadd.f32 %v1458_v10, %v1457_v2 }
 0x322   : > { %v1460_v18 = vpop.f32.mrf.mxu1 }
 0x323   : > { %1064 = vst.msk [vmem:[%s2372_s13 + $0x8] sm:$0xff] %vm1062_vm1, %v1459_v17 }
 0x324   : > { %v1461_v13 = vpop.f32.mrf.mxu1 }
 0x325   : > { %v1462_v48 = vadd.f32 %v1461_v13, %v1460_v18 }
 0x326   : > { %v1463_v49 = vpop.f32.mrf.mxu1 }
 0x327   : > { %1065 = vst.msk [vmem:[%s2372_s13 + $0x10] sm:$0xff] %vm1062_vm1, %v1462_v48 }
 0x328   : > { %v1464_v55 = vpop.f32.mrf.mxu1 }
 0x329   : > { %v1465_v33 = vadd.f32 %v1464_v55, %v1463_v49 }
 0x32a   : > { %v1466_v22 = vpop.f32.mrf.mxu1 }
 0x32b   : > { %1066 = vst.msk [vmem:[%s2372_s13 + $0x18] sm:$0xff] %vm1062_vm1, %v1465_v33 }
 0x32c   : > { %v1467_v25 = vpop.f32.mrf.mxu1 }
 0x32d   : > { %v1468_v8 = vadd.f32 %v1467_v25, %v1466_v22 }
 0x32e   : > { %v1469_v9 = vpop.f32.mrf.mxu1 }
 0x32f   : > { %1067 = vst.msk [vmem:[%s2372_s13 + $0x20] sm:$0xff] %vm1062_vm1, %v1468_v8 }
 0x330   : > { %v1470_v60 = vpop.f32.mrf.mxu1 }
 0x331   : > { %v1471_v38 = vadd.f32 %v1470_v60, %v1469_v9 }
 0x332   : > { %v1472_v51 = vpop.f32.mrf.mxu1 }
 0x333   : > { %1068 = vst.msk [vmem:[%s2372_s13 + $0x28] sm:$0xff] %vm1062_vm1, %v1471_v38 }
 0x334   : > { %v1473_v52 = vpop.f32.mrf.mxu1 }
 0x335   : > { %v1474_v0 = vadd.f32 %v1473_v52, %v1472_v51 }
 0x336   : > { %v1475_v63 = vpop.f32.mrf.mxu1 }
 0x337   : > { %1069 = vst.msk [vmem:[%s2372_s13 + $0x30] sm:$0xff] %vm1062_vm1, %v1474_v0 }
 0x338   : > { %v1476_v28 = vpop.f32.mrf.mxu1 }
 0x339   : > { %v1477_v31 = vadd.f32 %v1476_v28, %v1475_v63 }
 0x33a   : > { %v1478_v53 = vpop.f32.mrf.mxu1 }
 0x33b   : > { %1070 = vst.msk [vmem:[%s2372_s13 + $0x38] sm:$0xff] %vm1062_vm1, %v1477_v31 }
 0x33c   : > { %v1479_v50 = vpop.f32.mrf.mxu1 }
 0x33d   : > { %v1480_v34 = vadd.f32 %v1479_v50, %v1478_v53 }
 0x33e   : > { %v1481_v35 = vpop.f32.mrf.mxu1 }
 0x33f   : > { %1071 = vst.msk [vmem:[%s2372_s13 + $0x40] sm:$0xff] %vm1062_vm1, %v1480_v34 }
 0x340   : > { %v1482_v19 = vpop.f32.mrf.mxu1 }
 0x341   : > { %v1483_v16 = vadd.f32 %v1482_v19, %v1481_v35 }
 0x342   : > { %v1484_v36 = vpop.f32.mrf.mxu1 }
 0x343   : > { %1072 = vst.msk [vmem:[%s2372_s13 + $0x48] sm:$0xff] %vm1062_vm1, %v1483_v16 }
 0x344   : > { %v1485_v57 = vpop.f32.mrf.mxu1 }
 0x345   : > { %v1486_v54 = vadd.f32 %v1485_v57, %v1484_v36 }
 0x346   : > { %v1487_v32 = vpop.f32.mrf.mxu1 }
 0x347   : > { %1073 = vst.msk [vmem:[%s2372_s13 + $0x50] sm:$0xff] %vm1062_vm1, %v1486_v54 }
 0x348   : > { %v1488_v11 = vpop.f32.mrf.mxu1 }
 0x349   : > { %v1489_v12 = vadd.f32 %v1488_v11, %v1487_v32 }
 0x34a   : > { %v1490_v41 = vpop.f32.mrf.mxu1 }
 0x34b   : > { %1074 = vst.msk [vmem:[%s2372_s13 + $0x58] sm:$0xff] %vm1062_vm1, %v1489_v12 }
 0x34c   : > { %v1491_v40 = vpop.f32.mrf.mxu1 }
 0x34d   : > { %v1492_v58 = vadd.f32 %v1491_v40, %v1490_v41 }
 0x34e   : > { %v1493_v37 = vpop.f32.mrf.mxu1 }
 0x34f   : > { %1075 = vst.msk [vmem:[%s2372_s13 + $0x60] sm:$0xff] %vm1062_vm1, %v1492_v58 }
 0x350   : > { %v1494_v59 = vpop.f32.mrf.mxu1 }
 0x351   : > { %v1495_v56 = vadd.f32 %v1494_v59, %v1493_v37 }
 0x352   : > { %v1496_v61 = vpop.f32.mrf.mxu1 }
 0x353   : > { %1076 = vst.msk [vmem:[%s2372_s13 + $0x68] sm:$0xff] %vm1062_vm1, %v1495_v56 }
 0x354   : > { %v1497_v39 = vpop.f32.mrf.mxu1 }
 0x355   : > { %v1498_v6 = vadd.f32 %v1497_v39, %v1496_v61 }
 0x356   : > { %v1499_v5 = vpop.f32.mrf.mxu1 }
 0x357   : > { %1077 = vst.msk [vmem:[%s2372_s13 + $0x70] sm:$0xff] %vm1062_vm1, %v1498_v6 }
 0x358   : > { %v1500_v29 = vpop.f32.mrf.mxu1 }
 0x359   : > { %v1501_v45 = vadd.f32 %v1500_v29, %v1499_v5 }
 0x35b   : > { %1078 = vst.msk [vmem:[%s2372_s13 + $0x78] sm:$0xff] %vm1062_vm1, %v1501_v45 }
 0x35c PF: > { %p1508_p3 = scmp.ge.s32.totalorder %s1763_s22, 2  ;;  %s1168_s28 = sand.u32 1, %s1735_s15  }
 0x35d   : > { %s1169_s23 = scalar_lea.sflag [#allocation3], %s1168_s28 }
 0x35e   : > { %p1505_p2 = pnand %p1508_p3, %p1853_p8 }
 0x360   : > { %p1506_p4 = pneg %p1505_p2 }
 0x362   : > { %1730 = dma.done.wait (%p1506_p4), %s1169_s23, 4096  }
 0x363   : > { %1732 = vsyncadd (%p1506_p4), %s1169_s23, 4294963200  ;;  %s18_s22 = sadd.s32 1, %s1763_s22   ;;  %s2443_s15 = smov %s1739_s16 }
 0x364   : > { %p15_p5 = scmp.ge.s32.totalorder %s18_s22, 6   ;;  %s2444_s16 = smov %s1743_s17 }
 0x365   : > { %s2445_s17 = smov %s1862_s7  ;;  %s2446_s18 = smov %s1755_s20 }
 0x366   : > { %s2447_s19 = smov %s1759_s21  ;;  %s2448_s20 = smov %s2451_s25 }
 0x367   : > { %s2449_s21 = smov %s2455_s26  ;;  %17 = sbr.rel (!%p15_p5) target bundleno = 5 (0x5), region = 85 }
 0x36c   :  { %1174 = vsyncpa [#allocation3], 1 }
 0x36d   :  { %1176 = vsyncpa [#allocation3 + $0x1], 1 }

</bundles_post_ra>
